<compile_context>
chip_gen: v7x
topology: tpu7x:2x2x1
jax: 0.10.0
libtpu: 0.0.40
codegen_flags: <defaults>
</compile_context>

<pallas_src>
import functools

import jax
import jax.numpy as jnp
from jax import lax
from jax.experimental import pallas as pl
from jax.experimental.pallas import tpu as pltpu


def _round_up(x: int, m: int) -> int:
    return (x + m - 1) // m * m


def _vmem_capacity_bytes() -> int:
    try:
        return int(pltpu.get_tpu_info().vmem_capacity_bytes)
    except Exception:
        return 64 * 1024 * 1024  # conservative fallback: v7x per-TensorCore VMEM


def _linear_decoder_kernel(x_ref, w_ref, scale_ref, o_ref):
    # x_ref:     (TM, Lp)  bias-augmented input row tile (f32 or bf16)
    # w_ref:     (Lp, O)   bias-augmented, pre-transposed weight, resident (Buffered(1))
    # scale_ref: (TM, 1)   org_norm[ids] per row (f32)
    # o_ref:     (TM, O)   output tile, O == out_dim (no lane padding)
    # Linear + bias, fused into one MXU contraction with f32 accumulation.
    y = jnp.dot(x_ref[...], w_ref[...], preferred_element_type=jnp.float32)

    # Row L2-norm rescale: y * org_norm[ids] / ||y|| as a single (TM, O) multiply.
    # No padded lanes in O, so the sum of squares is exact.
    sumsq = jnp.sum(y * y, axis=-1, keepdims=True)
    inv = scale_ref[...] * lax.rsqrt(sumsq + 1e-12)   # EUP rsqrt; eps guards ||y||==0
    o_ref[...] = (y * inv).astype(o_ref.dtype)


@functools.partial(jax.jit,
                   static_argnames=("block_rows", "compute_dtype", "out_dtype"))
def linear_decoder(x, w_t, b, org_norm, ids, *, block_rows=256,
                   compute_dtype=None, out_dtype=None):
    """x: (N, latent_dim), w_t: (latent_dim, out_dim) (nn.Linear weight transposed),
    b: (out_dim,), org_norm: (num_orgs,) f32, ids: (N,) int32 -> (N, out_dim).

    compute_dtype: cast x / weight (e.g. jnp.bfloat16; recommended on v6e/v7x) —
    accumulation and norm math stay f32.
    out_dtype: output storage dtype (e.g. jnp.bfloat16 halves HBM writeback)."""
    n, latent_dim = x.shape
    out_dim = w_t.shape[1]
    if out_dtype is None:
        out_dtype = x.dtype
    if compute_dtype is None:
        compute_dtype = x.dtype

    xi = jnp.dtype(compute_dtype).itemsize
    oi = jnp.dtype(out_dtype).itemsize
    row_align = max(8, 32 // xi)          # sublane multiple: 8 f32, 16 bf16, 32 int8

    # ---- Fold bias into the contraction: x_aug = [x | 1 | 0..], w_aug = [[w_t],[b],[0..]]
    latent_p = _round_up(latent_dim + 1, row_align)
    x_aug = jnp.concatenate(
        [x.astype(compute_dtype),
         jnp.ones((n, 1), compute_dtype),
         jnp.zeros((n, latent_p - latent_dim - 1), compute_dtype)], axis=1)
    w_aug = jnp.concatenate(
        [w_t.astype(compute_dtype),
         b.astype(compute_dtype).reshape(1, out_dim),
         jnp.zeros((latent_p - latent_dim - 1, out_dim), compute_dtype)], axis=0)

    # Per-row scale (gather stays as cheap JAX glue; padded rows get scale 0 -> output 0).
    scale = org_norm.astype(jnp.float32)[ids].reshape(n, 1)

    # ---- Generation-aware VMEM budget and row-tile sizing.
    vmem_cap = _vmem_capacity_bytes()
    usable = (vmem_cap * 3) // 4          # headroom for compiler-internal scratch
    out_vmem = _round_up(out_dim, 128)    # VMEM lane padding of in-flight tiles
    fixed_bytes = latent_p * out_vmem * xi            # resident weight, single-buffered
    per_row = (2 * latent_p * xi                      # x tiles (double-buffered)
               + 2 * 128 * 4                          # (tm,1) scale, lane-padded, x2
               + 2 * out_vmem * oi                    # output tiles (double-buffered)
               + out_vmem * 4)                        # in-body f32 y
    if fixed_bytes + per_row * row_align > usable:
        # TODO(synk): add a column-tiled two-phase-norm streaming path for decoders
        # whose weight does not fit VMEM single-buffered (earliest hit on v7x's 64 MiB).
        raise ValueError(
            f"LinearDecoder weight ({fixed_bytes} B) does not fit the resident-VMEM "
            f"kernel (usable VMEM {usable} B of {vmem_cap} B)")

    tm = min(block_rows, (usable - fixed_bytes) // per_row)
    # keep >= ~8 grid steps so both v7x TensorCores get work and the pipeline overlaps
    tm = min(tm, max(row_align, _round_up(pl.cdiv(n, 8), row_align)))
    tm = max(row_align, (tm // row_align) * row_align)

    n_p = _round_up(n, tm)
    if n_p != n:
        x_aug = jnp.pad(x_aug, ((0, n_p - n), (0, 0)))
        scale = jnp.pad(scale, ((0, n_p - n), (0, 0)))
    grid = (n_p // tm,)

    vmem_limit = fixed_bytes + per_row * tm + (8 << 20)
    vmem_limit = int(min(max(vmem_limit, 32 << 20), vmem_cap - (2 << 20)))

    out = pl.pallas_call(
        _linear_decoder_kernel,
        out_shape=jax.ShapeDtypeStruct((n_p, out_dim), out_dtype),
        grid_spec=pltpu.PrefetchScalarGridSpec(
            num_scalar_prefetch=0,
            grid=grid,
            in_specs=[
                pl.BlockSpec((tm, latent_p), lambda i: (i, 0)),
                pl.BlockSpec((latent_p, out_dim), lambda i: (0, 0),
                             pipeline_mode=pl.Buffered(1)),   # constant, resident weight
                pl.BlockSpec((tm, 1), lambda i: (i, 0)),
            ],
            out_specs=pl.BlockSpec((tm, out_dim), lambda i: (i, 0)),
        ),
        compiler_params=pltpu.CompilerParams(
            dimension_semantics=("parallel",),
            vmem_limit_bytes=vmem_limit,
        ),
    )(x_aug, w_aug, scale)

    # Only the rows may be padded; out_dim is emitted exactly (no column slice pass).
    return out if n_p == n else out[:n]


def reference(x, w_t, b, org_norm, ids):
    y = x @ w_t + b
    norm = jnp.linalg.norm(y, axis=-1, keepdims=True)
    return y * org_norm[ids][:, None] / norm


if __name__ == "__main__":
    key = jax.random.PRNGKey(0)
    k_x, k_w, k_b, k_norm, k_ids = jax.random.split(key, 5)

    N = 512          # flattened rows (e.g. batch * seq)
    LATENT = 64      # latent_dim
    OUT = 192        # out_dim (not a multiple of 128 -> exercises full-extent out block)
    NUM_ORGS = 10    # size of org_norm lookup table

    x = jax.random.normal(k_x, (N, LATENT), dtype=jnp.float32)
    # nn.Linear weight is (out_dim, latent_dim); the kernel takes it transposed.
    w = jax.random.normal(k_w, (OUT, LATENT), dtype=jnp.float32) * (1.0 / LATENT**0.5)
    w_t = jnp.asarray(w.T)
    b = jax.random.normal(k_b, (OUT,), dtype=jnp.float32) * 0.01
    org_norm = jax.random.uniform(k_norm, (NUM_ORGS,), dtype=jnp.float32,
                                  minval=0.5, maxval=2.0)
    ids = jax.random.randint(k_ids, (N,), 0, NUM_ORGS, dtype=jnp.int32)

    ref = reference(x, w_t, b, org_norm, ids)

    # f32 path (matches the PyTorch module numerically).
    out = linear_decoder(x, w_t, b, org_norm, ids)
    out = jax.block_until_ready(out)
    assert out.shape == (N, OUT)
    assert jnp.allclose(out, ref, atol=2e-4, rtol=2e-4), (
        f"f32 max abs err = {jnp.max(jnp.abs(out - ref))}")

    # bf16 compute path (recommended MXU fast path on v6e/v7x), f32 accumulation.
    out_bf16c = linear_decoder(x, w_t, b, org_norm, ids,
                               compute_dtype=jnp.bfloat16)
    out_bf16c = jax.block_until_ready(out_bf16c)
    assert out_bf16c.shape == (N, OUT)
    assert jnp.allclose(out_bf16c.astype(jnp.float32), ref, atol=5e-2, rtol=5e-2), (
        f"bf16-compute max abs err = "
        f"{jnp.max(jnp.abs(out_bf16c.astype(jnp.float32) - ref))}")

    # bf16 output path (halves HBM writeback / vst count on v5e), f32 compute + norm.
    out_bf16o = linear_decoder(x, w_t, b, org_norm, ids,
                               out_dtype=jnp.bfloat16)
    out_bf16o = jax.block_until_ready(out_bf16o)
    assert out_bf16o.shape == (N, OUT) and out_bf16o.dtype == jnp.bfloat16
    assert jnp.allclose(out_bf16o.astype(jnp.float32), ref, atol=2e-2, rtol=2e-2), (
        f"bf16-out max abs err = "
        f"{jnp.max(jnp.abs(out_bf16o.astype(jnp.float32) - ref))}")

    print("KERNEL_OK")
</pallas_src>

<mosaic_0001>
module attributes {stable_mosaic.version = 11 : i64} {
  func.func @_linear_decoder_kernel(%arg0: i32, %arg1: memref<64x72xf32, #tpu.memory_space<vmem>>, %arg2: memref<72x192xf32, #tpu.memory_space<vmem>>, %arg3: memref<64x1xf32, #tpu.memory_space<vmem>>, %arg4: memref<64x192xf32, #tpu.memory_space<vmem>>) attributes {dimension_semantics = [#tpu.dimension_semantics<parallel>], iteration_bounds = array<i64: 8>, scalar_prefetch = 0 : i64, scratch_operands = 0 : i64, tpu.core_type = #tpu.core_type<tc>, window_params = [{transform_indices = @transform_0, window_bounds = array<i64: 64, 72>}, {pipeline_mode = #tpu.pipeline_mode<synchronous>, transform_indices = @transform_1, window_bounds = array<i64: 72, 192>}, {transform_indices = @transform_2, window_bounds = array<i64: 64, 1>}, {transform_indices = @transform_3, window_bounds = array<i64: 64, 192>}]} {
    %c0 = arith.constant 0 : index
    %c0_0 = arith.constant 0 : index
    %0 = vector.load %arg1[%c0, %c0_0] : memref<64x72xf32, #tpu.memory_space<vmem>>, vector<64x72xf32>
    %c0_1 = arith.constant 0 : index
    %c0_2 = arith.constant 0 : index
    %1 = vector.load %arg2[%c0_1, %c0_2] : memref<72x192xf32, #tpu.memory_space<vmem>>, vector<72x192xf32>
    %cst = arith.constant dense<0.000000e+00> : vector<64x192xf32>
    %2 = tpu.matmul %0, %1, %cst {dimension_numbers = #tpu.dot_dimension_numbers<[1], [0], [0], [1], [0, 0, 1, 1], [], []>} : vector<64x72xf32>, vector<72x192xf32>, vector<64x192xf32> -> vector<64x192xf32>
    %3 = arith.mulf %2, %2 : vector<64x192xf32>
    %cst_3 = arith.constant dense<0.000000e+00> : vector<64xf32>
    %4 = vector.multi_reduction <add>, %3, %cst_3 [1] : vector<64x192xf32> to vector<64xf32>
    %5 = vector.shape_cast %4 : vector<64xf32> to vector<64x1xf32>
    %c0_4 = arith.constant 0 : index
    %c0_5 = arith.constant 0 : index
    %6 = vector.load %arg3[%c0_4, %c0_5] : memref<64x1xf32, #tpu.memory_space<vmem>>, vector<64x1xf32>
    %cst_6 = arith.constant 9.99999996E-13 : f32
    %7 = vector.broadcast %cst_6 : f32 to vector<64x1xf32>
    %8 = arith.addf %5, %7 : vector<64x1xf32>
    %9 = math.rsqrt %8 : vector<64x1xf32>
    %10 = arith.mulf %6, %9 : vector<64x1xf32>
    %11 = vector.broadcast %10 : vector<64x1xf32> to vector<64x192xf32>
    %12 = arith.mulf %2, %11 : vector<64x192xf32>
    %c0_7 = arith.constant 0 : index
    %c0_8 = arith.constant 0 : index
    %13 = vector.load %arg4[%c0_7, %c0_8] : memref<64x192xf32, #tpu.memory_space<vmem>>, vector<64x192xf32>
    tpu.vector_store %arg4[%c0_7, %c0_8], %12 {strides = array<i32>} : memref<64x192xf32, #tpu.memory_space<vmem>>, vector<64x192xf32>,
    return
  }
  func.func @transform_0(%arg0: i32) -> (i32, i32) {
    %c0_i32 = arith.constant 0 : i32
    %c0_i32_0 = arith.constant 0 : i32
    return %arg0, %c0_i32 : i32, i32
  }
  func.func @transform_1(%arg0: i32) -> (i32, i32) {
    %c0_i32 = arith.constant 0 : i32
    %c0_i32_0 = arith.constant 0 : i32
    %c0_i32_1 = arith.constant 0 : i32
    return %c0_i32, %c0_i32_0 : i32, i32
  }
  func.func @transform_2(%arg0: i32) -> (i32, i32) {
    %c0_i32 = arith.constant 0 : i32
    %c0_i32_0 = arith.constant 0 : i32
    return %arg0, %c0_i32 : i32, i32
  }
  func.func @transform_3(%arg0: i32) -> (i32, i32) {
    %c0_i32 = arith.constant 0 : i32
    %c0_i32_0 = arith.constant 0 : i32
    return %arg0, %c0_i32 : i32, i32
  }
}

</mosaic_0001>

<bundles_post_ra>
// kernel: linear_decoder.1
= control target key start
LH: loop header
LB: loop body
LE: loop exit
PB: predicated region body
PF: predicated region fallthrough
CT: control target
= control target key end

     0   :  { %s692_s12 = smov 0   ;;  %s914_s0 = inlined_call_operand.vmem [shape: f32[512,72], index: 0, kind: input, shape index: {}]   ;;  %s915_s1 = inlined_call_operand.vmem [shape: f32[72,192], index: 1, kind: input, shape index: {}]   ;;  %s916_s2 = inlined_call_operand.vmem [shape: f32[512,1], index: 2, kind: input, shape index: {}]   ;;  %s917_s3 = inlined_call_operand.vmem [shape: f32[512,192], index: 3, kind: output, shape index: {}]  }
   0x1 LB: > { %s585_s13 = sadd.s32 4294967295, %s668_s12   ;;  %p589_p0 = scmp.ge.s32.totalorder %s668_s12, 1  ;;  %s668_s12 = sphi %s692_s12, %s13_s12  }
   0x2   : > { %p149_p1 = scmp.lt.s32.totalorder %s668_s12, 9 }
   0x4   : > { %p150_p2 = pnand %p589_p0, %p149_p1 }
   0x5   : > { %v207_v0 = vld [vmem:[%s915_s1 + $0x8] sm:$0xff] (!%p150_p2)  ;;  %v209_v1 = vld [vmem:[%s915_s1 + $0x18] sm:$0xff] (!%p150_p2)  ;;  %v206_v2 = vld [vmem:[%s915_s1] sm:$0xff] (!%p150_p2)  ;;  %v670_v7 = vmov (!%p150_p2), 0.0   ;;  %s590_s26 = sshll.u32 (!%p150_p2), %s585_s13, 3  ;;  %vm224_vm0 = vcmask (!%p150_p2), 588800  }
   0x6   : > { %153 = sbr.rel (%p150_p2) target bundleno = 560 (0x230), region = 32  ;;  %v608_v3 = vpack.c.bf16 (!%p150_p2), %v209_v1, %v207_v0  ;;  %v208_v4 = vld [vmem:[%s915_s1 + $0x10] sm:$0xff] (!%p150_p2)  ;;  %v211_v5 = vld [vmem:[%s915_s1 + $0x28] sm:$0xff] (!%p150_p2)  ;;  %v213_v6 = vld [vmem:[%s915_s1 + $0x38] sm:$0xff] (!%p150_p2)  ;;  %313 = vmatprep.mubr.f32.mxu0 (!%p150_p2), %v670_v7  ;;  %337 = vmatprep.mubr.f32.mxu1 (!%p150_p2), %v670_v7  ;;  %p180_p3 = scmp.lt.s32.totalorder (!%p150_p2), %s590_s26, 63  ;;  %vm378_vm1 = vcmask (!%p150_p2), 523264  }
   0x7   : > { %v610_v8 = vpack.c.bf16 (!%p150_p2), %v208_v4, %v206_v2  ;;  %v612_v9 = vpack.c.bf16 (!%p150_p2), %v213_v6, %v211_v5  ;;  %v210_v10 = vld [vmem:[%s915_s1 + $0x20] sm:$0xff] (!%p150_p2)  ;;  %v212_v11 = vld [vmem:[%s915_s1 + $0x30] sm:$0xff] (!%p150_p2)  ;;  %v215_v12 = vld [vmem:[%s915_s1 + $0x48] sm:$0xff] (!%p150_p2) }
   0x8   : > { %609 = vmatprep.subr.bf16.mxu0 (!%p150_p2), %v608_v3  ;;  %624 = vmatprep.subr.bf16.mxu1 (!%p150_p2), %v608_v3  ;;  %v217_v13 = vld [vmem:[%s915_s1 + $0x58] sm:$0xff] (!%p150_p2)  ;;  %v614_v14 = vpack.c.bf16 (!%p150_p2), %v212_v11, %v210_v10  ;;  %v214_v16 = vld [vmem:[%s915_s1 + $0x40] sm:$0xff] (!%p150_p2)  ;;  %v216_v17 = vld [vmem:[%s915_s1 + $0x50] sm:$0xff] (!%p150_p2) }
   0x9   : > { %611 = vmatpush1.bf16.msra.mxu0 (!%p150_p2), %v610_v8  ;;  %629 = vmatpush1.bf16.msra.mxu1 (!%p150_p2), %v610_v8  ;;  %v616_v15 = vpack.c.bf16 (!%p150_p2), %v217_v13, %v215_v12  ;;  %v219_v18 = vld [vmem:[%s915_s1 + $0x68] sm:$0xff] (!%p150_p2)  ;;  %v221_v19 = vld [vmem:[%s915_s1 + $0x78] sm:$0xff] (!%p150_p2)  ;;  %v618_v20 = vpack.c.bf16 (!%p150_p2), %v216_v17, %v214_v16  ;;  %v218_v22 = vld [vmem:[%s915_s1 + $0x60] sm:$0xff] (!%p150_p2) }
   0xa   : > { %613 = vmatprep.subr.bf16.mxu0 (!%p150_p2), %v612_v9  ;;  %625 = vmatprep.subr.bf16.mxu1 (!%p150_p2), %v612_v9  ;;  %v620_v21 = vpack.c.bf16 (!%p150_p2), %v221_v19, %v219_v18  ;;  %v220_v23 = vld [vmem:[%s915_s1 + $0x70] sm:$0xff] (!%p150_p2)  ;;  %v223_v25 = vld [vmem:[%s915_s1 + $0x88] sm:$0xff] (!%p150_p2)  ;;  %v222_v26 = vld [vmem:[%s915_s1 + $0x80] sm:$0xff] (!%p150_p2)  ;;  %v671_v19 = vmov (!%p150_p2), 0  }
   0xb   : > { %v622_v24 = vpack.c.bf16 (!%p150_p2), %v220_v23, %v218_v22  ;;  %644 = vset.pattern.permute.xlu0 (!%p150_p2), %v671_v19  ;;  %645 = vset.pattern.permute.xlu1 (!%p150_p2), %v671_v19 }
   0xd   : > { %615 = vmatpush1.bf16.msra.mxu0 %v614_v14  ;;  %630 = vmatpush1.bf16.msra.mxu1 %v614_v14  ;;  %s919_s26 = smov (!%p180_p3, %s590_s26), 63 }
   0xe   : > { %617 = vmatprep.subr.bf16.mxu0 %v616_v15  ;;  %626 = vmatprep.subr.bf16.mxu1 %v616_v15  ;;  %s591_s21 = sshll.u32 %s919_s26, 3  ;;  %s607_s6 = sshll.u32 %s919_s26, 4 }
   0xf   : > { %s183_s27 = scalar_lea.vmem %s914_s0, %s591_s21  ;;  %s855_s5 = scalar_lea.vmem %s916_s2, %s591_s21 }
  0x10   : > { %v198_v27 = vld [vmem:[%s183_s27] sm:$0xff]  ;;  %v199_v29 = vld [vmem:[%s183_s27 + $0x8] sm:$0xff]  ;;  %v200_v31 = vld [vmem:[%s183_s27 + $0x10] sm:$0xff]  ;;  %s869_s9 = scalar_lea.vmem %s917_s3, %s607_s6 }
  0x11   : > { %619 = vmatpush1.bf16.msra.mxu0 %v618_v20  ;;  %631 = vmatpush1.bf16.msra.mxu1 %v618_v20  ;;  %v202_v28 = vld [vmem:[%s183_s27 + $0x20] sm:$0xff]  ;;  %v203_v30 = vld [vmem:[%s183_s27 + $0x28] sm:$0xff]  ;;  %v204_v32 = vld [vmem:[%s183_s27 + $0x30] sm:$0xff] }
  0x12   : > { %621 = vmatprep.subr.bf16.mxu0 %v620_v21  ;;  %627 = vmatprep.subr.bf16.mxu1 %v620_v21  ;;  %v201_v33 = vld [vmem:[%s183_s27 + $0x18] sm:$0xff] }
  0x13   : > { %v205_v34 = vld [vmem:[%s183_s27 + $0x38] sm:$0xff] }
  0x15   : > { %623 = vmatpush1.bf16.msra.mxu0 %v622_v24  ;;  %632 = vmatpush1.bf16.msra.mxu1 %v622_v24 }
  0x16   : > { %265 = vmatprep.subr.mxu0 %v223_v25  ;;  %628 = vmatprep.subr.mxu1 %v223_v25 }
  0x19   : > { %266 = vmatpush1.msra.mxu0 %v222_v26  ;;  %633 = vmatpush1.msra.mxu1 %v222_v26 }
  0x1a   : > { %597 = vmatmul.mubr.msk.f32.vlgmr.msra.gmra.mrb[0].mxu0 %vm224_vm0, %v198_v27  ;;  %601 = vmatmul.mubr.msk.f32.vlgmr.msra.gmra.mrb[0].mxu1 %vm224_vm0, %v202_v28 }
  0x1b   : > { %319 = vmatprep.mubr.f32.mxu0 %v670_v7  ;;  %343 = vmatprep.mubr.f32.mxu1 %v670_v7 }
  0x1e   : > { %598 = vmatmul.mubr.msk.f32.gmra.mrb[2].mxu0 %vm224_vm0, %v199_v29  ;;  %602 = vmatmul.mubr.msk.f32.gmra.mrb[2].mxu1 %vm224_vm0, %v203_v30  ;;  %v411_v29 = vld [vmem:[%s855_s5] sm:$0xff] }
  0x1f   : > { %325 = vmatprep.mubr.f32.mxu0 %v670_v7  ;;  %349 = vmatprep.mubr.f32.mxu1 %v670_v7 }
  0x22   : > { %599 = vmatmul.mubr.msk.f32.gmra.mrb[4].mxu0 %vm224_vm0, %v200_v31  ;;  %603 = vmatmul.mubr.msk.f32.gmra.mrb[4].mxu1 %vm224_vm0, %v204_v32 }
  0x23   : > { %331 = vmatprep.mubr.f32.mxu0 %v670_v7  ;;  %355 = vmatprep.mubr.f32.mxu1 %v670_v7 }
  0x26   : > { %600 = vmatmul.mubr.msk.f32.gmra.mrb[6].mxu0 %vm224_vm0, %v201_v33  ;;  %604 = vmatmul.mubr.msk.f32.gmra.mrb[6].mxu1 %vm224_vm0, %v205_v34  ;;  %v415_v34 = vld [vmem:[%s855_s5 + $0x20] sm:$0xff] }
  0xed   : > { %v778_v35 = vpop.f32.mrb[0].mxu0  ;;  %v780_v36 = vpop.f32.mrb[0].mxu1 }
  0xee   : > { %v782_v37 = vpop.f32.mrb[1].mxu0  ;;  %v370_v38 = vmul.f32 %v780_v36, %v780_v36  ;;  %v786_v39 = vpop.f32.mrb[1].mxu1  ;;  %v362_v42 = vmul.f32 %v778_v35, %v778_v35 }
  0xef   : > { %v363_v40 = vmul.f32 %v782_v37, %v782_v37  ;;  %v371_v41 = vmul.f32 %v786_v39, %v786_v39 }
  0xf1   : > { %v794_v43 = vpop.f32.mrb[2].mxu0  ;;  %v379_v44 = vsel %vm378_vm1, %v363_v40, 0.0  ;;  %v797_v45 = vpop.f32.mrb[2].mxu1  ;;  %v395_v46 = vsel %vm378_vm1, %v371_v41, 0.0 }
  0xf2   : > { %v364_v47 = vmul.f32 %v794_v43, %v794_v43  ;;  %v380_v48 = vadd.f32 %v379_v44, %v362_v42  ;;  %v802_v49 = vpop.f32.mrb[3].mxu0  ;;  %v372_v50 = vmul.f32 %v797_v45, %v797_v45  ;;  %v806_v51 = vpop.f32.mrb[3].mxu1  ;;  %v396_v52 = vadd.f32 %v395_v46, %v370_v38  ;;  %v412_v44 = vld [vmem:[%s855_s5 + $0x8] sm:$0xff] }
  0xf3   : > { %v365_v53 = vmul.f32 %v802_v49, %v802_v49  ;;  %v373_v54 = vmul.f32 %v806_v51, %v806_v51 }
  0xf4   : > { %381 = vadd.xlane.f32.xlu0 %v380_v48 }
  0xf5   : > { %v812_v55 = vpop.f32.mrb[4].mxu0  ;;  %v383_v56 = vsel %vm378_vm1, %v365_v53, 0.0  ;;  %v399_v57 = vsel %vm378_vm1, %v373_v54, 0.0  ;;  %v816_v58 = vpop.f32.mrb[4].mxu1  ;;  %v416_v53 = vld [vmem:[%s855_s5 + $0x28] sm:$0xff] }
  0xf6   : > { %v366_v59 = vmul.f32 %v812_v55, %v812_v55  ;;  %v384_v60 = vadd.f32 %v383_v56, %v364_v47  ;;  %v820_v61 = vpop.f32.mrb[5].mxu0  ;;  %v400_v62 = vadd.f32 %v399_v57, %v372_v50  ;;  %v374_v63 = vmul.f32 %v816_v58, %v816_v58  ;;  %v824_v0 = vpop.f32.mrb[5].mxu1 }
  0xf7   : > { %v367_v1 = vmul.f32 %v820_v61, %v820_v61  ;;  %v375_v2 = vmul.f32 %v824_v0, %v824_v0 }
  0xf8   : > { %397 = vadd.xlane.f32.xlu0 %v396_v52  ;;  %401 = vadd.xlane.f32.xlu1 %v400_v62 }
  0xf9   : > { %v387_v3 = vsel %vm378_vm1, %v367_v1, 0.0  ;;  %v831_v4 = vpop.f32.mrb[6].mxu0  ;;  %v403_v5 = vsel %vm378_vm1, %v375_v2, 0.0  ;;  %v834_v6 = vpop.f32.mrb[6].mxu1 }
  0xfa   : > { %v388_v7 = vadd.f32 %v387_v3, %v366_v59  ;;  %v368_v8 = vmul.f32 %v831_v4, %v831_v4  ;;  %v838_v9 = vpop.f32.mrb[7].mxu0  ;;  %v404_v10 = vadd.f32 %v403_v5, %v374_v63  ;;  %v376_v11 = vmul.f32 %v834_v6, %v834_v6  ;;  %v842_v12 = vpop.f32.mrb[7].mxu1  ;;  %v413_v59 = vld [vmem:[%s855_s5 + $0x10] sm:$0xff]  ;;  %v414_v3 = vld [vmem:[%s855_s5 + $0x18] sm:$0xff] }
  0xfb   : > { %v369_v13 = vmul.f32 %v838_v9, %v838_v9  ;;  %v377_v14 = vmul.f32 %v842_v12, %v842_v12  ;;  %v417_v63 = vld [vmem:[%s855_s5 + $0x30] sm:$0xff] }
  0xfc   : > { %385 = vadd.xlane.f32.xlu0 %v384_v60  ;;  %389 = vadd.xlane.f32.xlu1 %v388_v7 }
  0xfd   : > { %v391_v15 = vsel %vm378_vm1, %v369_v13, 0.0  ;;  %v407_v16 = vsel %vm378_vm1, %v377_v14, 0.0 }
  0xfe   : > { %v392_v17 = vadd.f32 %v391_v15, %v368_v8  ;;  %v408_v18 = vadd.f32 %v407_v16, %v376_v11  ;;  %v418_v8 = vld [vmem:[%s855_s5 + $0x38] sm:$0xff] }
 0x100   : > { %405 = vadd.xlane.f32.xlu0 %v404_v10  ;;  %393 = vadd.xlane.f32.xlu1 %v392_v17 }
 0x104   : > { %409 = vadd.xlane.f32.xlu1 %v408_v18 }
 0x181   : > { %v382_v20 = vpop.xlane.xlu0 %381 }
 0x182   : > { %v419_v21 = vadd.f32 1e-12, %v382_v20 }
 0x184   : > { %646 = vrsqrt.f32 %v419_v21 }
 0x185   : > { %v398_v22 = vpop.xlane.xlu0 %397  ;;  %v402_v23 = vpop.xlane.xlu1 %401 }
 0x186   : > { %v423_v24 = vadd.f32 1e-12, %v398_v22  ;;  %v424_v27 = vadd.f32 1e-12, %v402_v23 }
 0x188   : > { %648 = vrsqrt.f32 %v423_v24 }
 0x189   : > { %v386_v25 = vpop.xlane.xlu0 %385  ;;  %v390_v28 = vpop.xlane.xlu1 %389 }
 0x18a   : > { %v420_v26 = vadd.f32 1e-12, %v386_v25  ;;  %v421_v31 = vadd.f32 1e-12, %v390_v28 }
 0x18c   : > { %650 = vrsqrt.f32 %v420_v26 }
 0x18d   : > { %652 = vrsqrt.f32 %v424_v27  ;;  %v406_v33 = vpop.xlane.xlu0 %405  ;;  %v394_v38 = vpop.xlane.xlu1 %393 }
 0x18e   : > { %v647_v30 = vpop.eup %646  ;;  %654 = vrsqrt.f32 %v421_v31  ;;  %v425_v41 = vadd.f32 1e-12, %v406_v33  ;;  %v422_v47 = vadd.f32 1e-12, %v394_v38 }
 0x18f   : > { %v435_v32 = vmul.f32 %v647_v30, %v411_v29 }
 0x190   : > { %656 = vrsqrt.f32 %v425_v41 }
 0x191   : > { %445 = vperm.xlu0 %644, %v435_v32   ;;  %v410_v50 = vpop.xlane.xlu1 %409  ;;  %658 = vrsqrt.f32 %v422_v47 }
 0x192   : > { %v649_v40 = vpop.eup %648  ;;  %v426_v54 = vadd.f32 1e-12, %v410_v50 }
 0x193   : > { %v439_v42 = vmul.f32 %v649_v40, %v415_v34 }
 0x194   : > { %660 = vrsqrt.f32 %v426_v54 }
 0x195   : > { %465 = vperm.xlu1 %645, %v439_v42  }
 0x196   : > { %v651_v46 = vpop.eup %650 }
 0x197   : > { %v436_v48 = vmul.f32 %v651_v46, %v412_v44  ;;  %v653_v52 = vpop.eup %652 }
 0x198   : > { %v440_v56 = vmul.f32 %v653_v52, %v416_v53  ;;  %v655_v57 = vpop.eup %654 }
 0x199   : > { %450 = vperm.xlu1 %645, %v436_v48   ;;  %v437_v60 = vmul.f32 %v655_v57, %v413_v59 }
 0x19a   : > { %v657_v62 = vpop.eup %656 }
 0x19b   : > { %v441_v1 = vmul.f32 %v657_v62, %v417_v63  ;;  %v659_v2 = vpop.eup %658 }
 0x19c   : > { %v438_v5 = vmul.f32 %v659_v2, %v414_v3 }
 0x19d   : > { %470 = vperm.xlu1 %645, %v440_v56  }
 0x19e   : > { %v661_v7 = vpop.eup %660 }
 0x19f   : > { %v442_v10 = vmul.f32 %v661_v7, %v418_v8 }
 0x1a1   : > { %455 = vperm.xlu1 %645, %v437_v60  }
 0x1a5   : > { %475 = vperm.xlu1 %645, %v441_v1  }
 0x1a9   : > { %460 = vperm.xlu1 %645, %v438_v5  }
 0x1ad   : > { %480 = vperm.xlu1 %645, %v442_v10  }
 0x210   : > { %v446_v11 = vpop.permute.xlu0 %445 }
 0x211   : > { %v483_v13 = vmul.f32 %v446_v11, %v778_v35  ;;  %v484_v14 = vmul.f32 %v446_v11, %v782_v37 }
 0x213   : > { %499 = vst [vmem:[%s869_s9] sm:$0xff] %v483_v13  ;;  %500 = vst.msk [vmem:[%s869_s9 + $0x8] sm:$0xff] %vm378_vm1, %v484_v14 }
 0x214   : > { %v466_v15 = vpop.permute.xlu1 %465 }
 0x215   : > { %v491_v16 = vmul.f32 %v466_v15, %v780_v36  ;;  %v492_v17 = vmul.f32 %v466_v15, %v786_v39 }
 0x217   : > { %507 = vst [vmem:[%s869_s9 + $0x40] sm:$0xff] %v491_v16  ;;  %508 = vst.msk [vmem:[%s869_s9 + $0x48] sm:$0xff] %vm378_vm1, %v492_v17 }
 0x218   : > { %v451_v18 = vpop.permute.xlu1 %450 }
 0x219   : > { %v485_v35 = vmul.f32 %v451_v18, %v794_v43  ;;  %v486_v37 = vmul.f32 %v451_v18, %v802_v49 }
 0x21b   : > { %501 = vst [vmem:[%s869_s9 + $0x10] sm:$0xff] %v485_v35  ;;  %502 = vst.msk [vmem:[%s869_s9 + $0x18] sm:$0xff] %vm378_vm1, %v486_v37 }
 0x21c   : > { %v471_v19 = vpop.permute.xlu1 %470 }
 0x21d   : > { %v493_v36 = vmul.f32 %v471_v19, %v797_v45  ;;  %v494_v39 = vmul.f32 %v471_v19, %v806_v51 }
 0x21f   : > { %509 = vst [vmem:[%s869_s9 + $0x50] sm:$0xff] %v493_v36  ;;  %510 = vst.msk [vmem:[%s869_s9 + $0x58] sm:$0xff] %vm378_vm1, %v494_v39 }
 0x220   : > { %v456_v20 = vpop.permute.xlu1 %455 }
 0x221   : > { %v487_v43 = vmul.f32 %v456_v20, %v812_v55  ;;  %v488_v49 = vmul.f32 %v456_v20, %v820_v61 }
 0x223   : > { %503 = vst [vmem:[%s869_s9 + $0x20] sm:$0xff] %v487_v43  ;;  %504 = vst.msk [vmem:[%s869_s9 + $0x28] sm:$0xff] %vm378_vm1, %v488_v49 }
 0x224   : > { %v476_v21 = vpop.permute.xlu1 %475 }
 0x225   : > { %v495_v45 = vmul.f32 %v476_v21, %v816_v58  ;;  %v496_v51 = vmul.f32 %v476_v21, %v824_v0 }
 0x227   : > { %511 = vst [vmem:[%s869_s9 + $0x60] sm:$0xff] %v495_v45  ;;  %512 = vst.msk [vmem:[%s869_s9 + $0x68] sm:$0xff] %vm378_vm1, %v496_v51 }
 0x228   : > { %v461_v22 = vpop.permute.xlu1 %460 }
 0x229   : > { %v489_v23 = vmul.f32 %v461_v22, %v831_v4  ;;  %v490_v55 = vmul.f32 %v461_v22, %v838_v9 }
 0x22b   : > { %505 = vst [vmem:[%s869_s9 + $0x30] sm:$0xff] %v489_v23  ;;  %506 = vst.msk [vmem:[%s869_s9 + $0x38] sm:$0xff] %vm378_vm1, %v490_v55 }
 0x22c   : > { %v481_v61 = vpop.permute.xlu1 %480 }
 0x22d   : > { %v497_v24 = vmul.f32 %v481_v61, %v834_v6  ;;  %v498_v25 = vmul.f32 %v481_v61, %v842_v12 }
 0x22f   : > { %513 = vst [vmem:[%s869_s9 + $0x70] sm:$0xff] %v497_v24  ;;  %514 = vst.msk [vmem:[%s869_s9 + $0x78] sm:$0xff] %vm378_vm1, %v498_v25 }
 0x230 PF: > { %s13_s12 = sadd.s32 1, %s668_s12  }
 0x231   : > { %p10_p4 = scmp.ge.s32.totalorder %s13_s12, 10  }
 0x233   :  { %12 = sbr.rel (!%p10_p4) target bundleno = 1 (0x1), region = 65 }

</bundles_post_ra>
